<compile_context>
chip_gen: v7x
topology: tpu7x:2x2x1
jax: 0.10.0
libtpu: 0.0.40
codegen_flags: <defaults>
</compile_context>

<pallas_src>
import functools

import jax
import jax.numpy as jnp
from jax.experimental import pallas as pl
from jax.experimental.pallas import tpu as pltpu

LANES = 128
SUBLANES = 8


def lstm_fc_kernel(seq, bpad, hidden,
                   x_ref, wih_ref, whh_ref, b_ref, wfc_ref, bfc_ref, out_ref):
    """x_ref: (seq*bpad, in_size) bf16 time-major slab; weights packed [i|f|o|g]."""
    H = hidden

    # Hoisted input projection for ALL timesteps: one bf16 MXU matmul, f32 accumulate.
    # Bias (b_ih + b_hh) folded in once here instead of per step.
    xg = (jnp.dot(x_ref[...], wih_ref[...], preferred_element_type=jnp.float32)
          + b_ref[...])                                    # (seq*bpad, 4H) f32

    whh = whh_ref[...]                                     # (H, 4H) bf16, loaded once
    # TODO(synk): if a bundle dump shows per-step vmatmul RHS-load latency dominating,
    #             hold whh resident via pltpu.matmul_push_rhs / matmul_acc_lhs / matmul_pop.

    # Hoisted lane mask: columns packed [i | f | o | g]; lanes < 3H -> sigmoid,
    # last H lanes -> tanh. Full-width activations keep EUP pushes whole-vreg.
    lane = jax.lax.broadcasted_iota(jnp.int32, (bpad, 4 * H), 1)
    sig_mask = lane < 3 * H

    h = jnp.zeros((bpad, H), jnp.float32)
    c = jnp.zeros((bpad, H), jnp.float32)

    # Statically unrolled recurrence (seq is a small Python int): static slice indices,
    # h/c stay as vreg values, and the LLO scheduler sees the whole loop body.
    # bpad == 8, so each per-step xg slice is exactly one (8, 128)-tiled sublane group.
    # TODO(synk): for long sequences / large batch, stage xg in VMEM scratch and switch
    #             to lax.fori_loop (bounds code size; keeps the slab small enough for
    #             v7x's 64 MiB VMEM), and add a batch grid axis with
    #             dimension_semantics=("parallel",) to use both v7x TensorCores.
    for t in range(seq):
        gates = (xg[t * bpad:(t + 1) * bpad, :]
                 + jnp.dot(h.astype(whh.dtype), whh,
                           preferred_element_type=jnp.float32))        # (bpad, 4H) f32
        act = jnp.where(sig_mask, jax.nn.sigmoid(gates), jnp.tanh(gates))
        i = act[:, :H]
        f = act[:, H:2 * H]
        o = act[:, 2 * H:3 * H]
        g = act[:, 3 * H:]
        c = f * c + i * g
        h = o * jnp.tanh(c)

    # Final fc on the last hidden state; output dim pre-padded to 128 lanes.
    logits = (jnp.dot(h.astype(wfc_ref.dtype), wfc_ref[...],
                      preferred_element_type=jnp.float32) + bfc_ref[...])
    out_ref[...] = logits.astype(out_ref.dtype)


def prepack_params(params):
    """One-time parameter preprocessing (do NOT run per forward call).

    PyTorch layout in: wih (in, 4H), whh (H, 4H), b (1, 4H) with gate columns
    [i, f, g, o]; wfc (H, C), bfc (1, C).
    Out: gate columns repacked to [i, f, o, g]; matmul weights cast to bf16;
    fc padded to a full 128-lane register (extra columns are zero).
    """
    wih, whh, b, wfc, bfc = params
    hidden = whh.shape[0]
    num_classes = wfc.shape[1]

    def repack(w):
        i, f, g, o = jnp.split(w, 4, axis=-1)
        return jnp.concatenate([i, f, o, g], axis=-1)

    wih_k = repack(wih).astype(jnp.bfloat16)
    whh_k = repack(whh).astype(jnp.bfloat16)
    b_k = repack(b).astype(jnp.float32)

    c_pad = ((num_classes + LANES - 1) // LANES) * LANES
    wfc_p = jnp.zeros((hidden, c_pad), jnp.bfloat16).at[:, :num_classes].set(
        wfc.astype(jnp.bfloat16))
    bfc_p = jnp.zeros((1, c_pad), jnp.float32).at[:, :num_classes].set(bfc)

    packed = (wih_k, whh_k, b_k, wfc_p, bfc_p)
    return packed, num_classes


@functools.partial(jax.jit, static_argnames=("num_classes",))
def lstm_model_forward(x, packed, *, num_classes):
    """x: (batch, seq, input_size) float32. Returns logits (batch, num_classes)."""
    wih_k, whh_k, b_k, wfc_p, bfc_p = packed
    batch, seq, in_size = x.shape
    hidden = whh_k.shape[0]
    c_pad = wfc_p.shape[1]

    # Pad batch up to a full sublane tile (8) and go time-major so every per-step slice
    # inside the kernel is tile-aligned. Padded rows carry garbage h/c through the
    # recurrence and are sliced away below (never user-visible).
    bpad = max(SUBLANES, ((batch + SUBLANES - 1) // SUBLANES) * SUBLANES)
    xt = jnp.transpose(x, (1, 0, 2))                       # (seq, batch, in)
    xt = jnp.pad(xt, ((0, 0), (0, bpad - batch), (0, 0)))  # (seq, bpad, in)
    x2d = xt.reshape(seq * bpad, in_size).astype(jnp.bfloat16)

    kernel = functools.partial(lstm_fc_kernel, seq, bpad, hidden)

    vmem = pltpu.MemorySpace.VMEM
    out = pl.pallas_call(
        kernel,
        out_shape=jax.ShapeDtypeStruct((bpad, c_pad), jnp.float32),
        in_specs=[pl.BlockSpec(memory_space=vmem) for _ in range(6)],
        out_specs=pl.BlockSpec(memory_space=vmem),
    )(x2d, wih_k, whh_k, b_k, wfc_p, bfc_p)

    return out[:batch, :num_classes]


def init_params(key, input_size, hidden, num_classes):
    """Deterministic params matching PyTorch LSTM/Linear semantics.

    PyTorch stores weight_ih as (4H, In) and weight_hh as (4H, H); we keep the
    transposed (In, 4H)/(H, 4H) layout (gate columns in PyTorch order i,f,g,o) for
    right-multiplication. b = b_ih + b_hh.
    """
    ks = jax.random.split(key, 6)
    s = 0.1
    wih = s * jax.random.normal(ks[0], (input_size, 4 * hidden), jnp.float32)
    whh = s * jax.random.normal(ks[1], (hidden, 4 * hidden), jnp.float32)
    b_ih = s * jax.random.normal(ks[2], (4 * hidden,), jnp.float32)
    b_hh = s * jax.random.normal(ks[3], (4 * hidden,), jnp.float32)
    b = (b_ih + b_hh).reshape(1, 4 * hidden)
    wfc = s * jax.random.normal(ks[4], (hidden, num_classes), jnp.float32)
    bfc = s * jax.random.normal(ks[5], (1, num_classes), jnp.float32)
    return wih, whh, b, wfc, bfc


def reference_forward(x, params):
    """Pure-JAX f32 reference with torch.nn.LSTM gate order (i, f, g, o) + Linear."""
    wih, whh, b, wfc, bfc = params
    batch = x.shape[0]
    hidden = whh.shape[0]
    h0 = jnp.zeros((batch, hidden), jnp.float32)
    c0 = jnp.zeros((batch, hidden), jnp.float32)

    def step(carry, x_t):
        h, c = carry
        gates = x_t @ wih + h @ whh + b
        i = jax.nn.sigmoid(gates[:, 0:hidden])
        f = jax.nn.sigmoid(gates[:, hidden:2 * hidden])
        g = jnp.tanh(gates[:, 2 * hidden:3 * hidden])
        o = jax.nn.sigmoid(gates[:, 3 * hidden:4 * hidden])
        c = f * c + i * g
        h = o * jnp.tanh(c)
        return (h, c), None

    (h, _), _ = jax.lax.scan(step, (h0, c0), jnp.transpose(x, (1, 0, 2)))
    return h @ wfc + bfc


if __name__ == "__main__":
    batch, seq, input_size = 2, 8, 16
    hidden, num_classes = 64, 5     # hidden_size=64 per the PyTorch module spec

    key = jax.random.PRNGKey(0)
    k_x, k_p = jax.random.split(key)
    x = jax.random.normal(k_x, (batch, seq, input_size), jnp.float32)
    params = init_params(k_p, input_size, hidden, num_classes)

    packed, n_cls = prepack_params(params)   # one-time; cached across calls

    out = jax.block_until_ready(lstm_model_forward(x, packed, num_classes=n_cls))
    ref = jax.block_until_ready(reference_forward(x, params))

    assert out.shape == (batch, num_classes)
    # Tolerance loosened vs the pure-f32 reference because matmul inputs are bf16
    # (error compounds over the 8 recurrent steps); gate/state math is still f32.
    assert jnp.allclose(out, ref, atol=5e-2, rtol=5e-2), (out, ref)
    print("KERNEL_OK")
</pallas_src>

<mosaic_0001>
module attributes {stable_mosaic.version = 11 : i64} {
  func.func @lstm_fc_kernel(%arg0: memref<64x16xbf16, #tpu.memory_space<vmem>>, %arg1: memref<16x256xbf16, #tpu.memory_space<vmem>>, %arg2: memref<64x256xbf16, #tpu.memory_space<vmem>>, %arg3: memref<1x256xf32, #tpu.memory_space<vmem>>, %arg4: memref<64x128xbf16, #tpu.memory_space<vmem>>, %arg5: memref<1x128xf32, #tpu.memory_space<vmem>>, %arg6: memref<8x128xf32, #tpu.memory_space<vmem>>) attributes {dimension_semantics = [], scalar_prefetch = 0 : i64, scratch_operands = 0 : i64, tpu.core_type = #tpu.core_type<tc>} {
    %c0 = arith.constant 0 : index
    %c0_0 = arith.constant 0 : index
    %0 = vector.load %arg0[%c0, %c0_0] : memref<64x16xbf16, #tpu.memory_space<vmem>>, vector<64x16xbf16>
    %c0_1 = arith.constant 0 : index
    %c0_2 = arith.constant 0 : index
    %1 = vector.load %arg1[%c0_1, %c0_2] : memref<16x256xbf16, #tpu.memory_space<vmem>>, vector<16x256xbf16>
    %cst = arith.constant dense<0.000000e+00> : vector<64x256xf32>
    %2 = tpu.matmul %0, %1, %cst {dimension_numbers = #tpu.dot_dimension_numbers<[1], [0], [0], [1], [0, 0, 1, 1], [], []>} : vector<64x16xbf16>, vector<16x256xbf16>, vector<64x256xf32> -> vector<64x256xf32>
    %c0_3 = arith.constant 0 : index
    %c0_4 = arith.constant 0 : index
    %3 = vector.load %arg3[%c0_3, %c0_4] : memref<1x256xf32, #tpu.memory_space<vmem>>, vector<1x256xf32>
    %4 = vector.broadcast %3 : vector<1x256xf32> to vector<64x256xf32>
    %5 = arith.addf %2, %4 : vector<64x256xf32>
    %c0_5 = arith.constant 0 : index
    %c0_6 = arith.constant 0 : index
    %6 = vector.load %arg2[%c0_5, %c0_6] : memref<64x256xbf16, #tpu.memory_space<vmem>>, vector<64x256xbf16>
    %7 = tpu.iota {dimensions = array<i32: 1>} : vector<8x256xi32>
    %c192_i32 = arith.constant 192 : i32
    %8 = vector.broadcast %c192_i32 : i32 to vector<8x256xi32>
    %9 = arith.cmpi slt, %7, %8 : vector<8x256xi32>
    %cst_7 = arith.constant 0.000000e+00 : f32
    %10 = vector.broadcast %cst_7 : f32 to vector<8x64xf32>
    %cst_8 = arith.constant 0.000000e+00 : f32
    %11 = vector.broadcast %cst_8 : f32 to vector<8x64xf32>
    %12 = vector.extract_strided_slice %5 {offsets = [0, 0], sizes = [8, 256], strides = [1, 1]} : vector<64x256xf32> to vector<8x256xf32>
    %13 = arith.truncf %10 : vector<8x64xf32> to vector<8x64xbf16>
    %cst_9 = arith.constant dense<0.000000e+00> : vector<8x256xf32>
    %14 = tpu.matmul %13, %6, %cst_9 {dimension_numbers = #tpu.dot_dimension_numbers<[1], [0], [0], [1], [0, 0, 1, 1], [], []>} : vector<8x64xbf16>, vector<64x256xbf16>, vector<8x256xf32> -> vector<8x256xf32>
    %15 = arith.addf %12, %14 : vector<8x256xf32>
    %16 = arith.negf %15 : vector<8x256xf32>
    %17 = math.exp %16 : vector<8x256xf32>
    %cst_10 = arith.constant 1.000000e+00 : f32
    %18 = vector.broadcast %cst_10 : f32 to vector<8x256xf32>
    %19 = arith.addf %18, %17 : vector<8x256xf32>
    %20 = arith.divf %18, %19 : vector<8x256xf32>
    %21 = math.tanh %15 : vector<8x256xf32>
    %22 = arith.select %9, %20, %21 : vector<8x256xi1>, vector<8x256xf32>
    %23 = vector.extract_strided_slice %22 {offsets = [0, 0], sizes = [8, 64], strides = [1, 1]} : vector<8x256xf32> to vector<8x64xf32>
    %24 = vector.extract_strided_slice %22 {offsets = [0, 64], sizes = [8, 64], strides = [1, 1]} : vector<8x256xf32> to vector<8x64xf32>
    %25 = vector.extract_strided_slice %22 {offsets = [0, 128], sizes = [8, 64], strides = [1, 1]} : vector<8x256xf32> to vector<8x64xf32>
    %26 = vector.extract_strided_slice %22 {offsets = [0, 192], sizes = [8, 64], strides = [1, 1]} : vector<8x256xf32> to vector<8x64xf32>
    %27 = arith.mulf %24, %11 : vector<8x64xf32>
    %28 = arith.mulf %23, %26 : vector<8x64xf32>
    %29 = arith.addf %27, %28 : vector<8x64xf32>
    %30 = math.tanh %29 : vector<8x64xf32>
    %31 = arith.mulf %25, %30 : vector<8x64xf32>
    %32 = vector.extract_strided_slice %5 {offsets = [8, 0], sizes = [8, 256], strides = [1, 1]} : vector<64x256xf32> to vector<8x256xf32>
    %33 = arith.truncf %31 : vector<8x64xf32> to vector<8x64xbf16>
    %cst_11 = arith.constant dense<0.000000e+00> : vector<8x256xf32>
    %34 = tpu.matmul %33, %6, %cst_11 {dimension_numbers = #tpu.dot_dimension_numbers<[1], [0], [0], [1], [0, 0, 1, 1], [], []>} : vector<8x64xbf16>, vector<64x256xbf16>, vector<8x256xf32> -> vector<8x256xf32>
    %35 = arith.addf %32, %34 : vector<8x256xf32>
    %36 = arith.negf %35 : vector<8x256xf32>
    %37 = math.exp %36 : vector<8x256xf32>
    %cst_12 = arith.constant 1.000000e+00 : f32
    %38 = vector.broadcast %cst_12 : f32 to vector<8x256xf32>
    %39 = arith.addf %38, %37 : vector<8x256xf32>
    %40 = arith.divf %38, %39 : vector<8x256xf32>
    %41 = math.tanh %35 : vector<8x256xf32>
    %42 = arith.select %9, %40, %41 : vector<8x256xi1>, vector<8x256xf32>
    %43 = vector.extract_strided_slice %42 {offsets = [0, 0], sizes = [8, 64], strides = [1, 1]} : vector<8x256xf32> to vector<8x64xf32>
    %44 = vector.extract_strided_slice %42 {offsets = [0, 64], sizes = [8, 64], strides = [1, 1]} : vector<8x256xf32> to vector<8x64xf32>
    %45 = vector.extract_strided_slice %42 {offsets = [0, 128], sizes = [8, 64], strides = [1, 1]} : vector<8x256xf32> to vector<8x64xf32>
    %46 = vector.extract_strided_slice %42 {offsets = [0, 192], sizes = [8, 64], strides = [1, 1]} : vector<8x256xf32> to vector<8x64xf32>
    %47 = arith.mulf %44, %29 : vector<8x64xf32>
    %48 = arith.mulf %43, %46 : vector<8x64xf32>
    %49 = arith.addf %47, %48 : vector<8x64xf32>
    %50 = math.tanh %49 : vector<8x64xf32>
    %51 = arith.mulf %45, %50 : vector<8x64xf32>
    %52 = vector.extract_strided_slice %5 {offsets = [16, 0], sizes = [8, 256], strides = [1, 1]} : vector<64x256xf32> to vector<8x256xf32>
    %53 = arith.truncf %51 : vector<8x64xf32> to vector<8x64xbf16>
    %cst_13 = arith.constant dense<0.000000e+00> : vector<8x256xf32>
    %54 = tpu.matmul %53, %6, %cst_13 {dimension_numbers = #tpu.dot_dimension_numbers<[1], [0], [0], [1], [0, 0, 1, 1], [], []>} : vector<8x64xbf16>, vector<64x256xbf16>, vector<8x256xf32> -> vector<8x256xf32>
    %55 = arith.addf %52, %54 : vector<8x256xf32>
    %56 = arith.negf %55 : vector<8x256xf32>
    %57 = math.exp %56 : vector<8x256xf32>
    %cst_14 = arith.constant 1.000000e+00 : f32
    %58 = vector.broadcast %cst_14 : f32 to vector<8x256xf32>
    %59 = arith.addf %58, %57 : vector<8x256xf32>
    %60 = arith.divf %58, %59 : vector<8x256xf32>
    %61 = math.tanh %55 : vector<8x256xf32>
    %62 = arith.select %9, %60, %61 : vector<8x256xi1>, vector<8x256xf32>
    %63 = vector.extract_strided_slice %62 {offsets = [0, 0], sizes = [8, 64], strides = [1, 1]} : vector<8x256xf32> to vector<8x64xf32>
    %64 = vector.extract_strided_slice %62 {offsets = [0, 64], sizes = [8, 64], strides = [1, 1]} : vector<8x256xf32> to vector<8x64xf32>
    %65 = vector.extract_strided_slice %62 {offsets = [0, 128], sizes = [8, 64], strides = [1, 1]} : vector<8x256xf32> to vector<8x64xf32>
    %66 = vector.extract_strided_slice %62 {offsets = [0, 192], sizes = [8, 64], strides = [1, 1]} : vector<8x256xf32> to vector<8x64xf32>
    %67 = arith.mulf %64, %49 : vector<8x64xf32>
    %68 = arith.mulf %63, %66 : vector<8x64xf32>
    %69 = arith.addf %67, %68 : vector<8x64xf32>
    %70 = math.tanh %69 : vector<8x64xf32>
    %71 = arith.mulf %65, %70 : vector<8x64xf32>
    %72 = vector.extract_strided_slice %5 {offsets = [24, 0], sizes = [8, 256], strides = [1, 1]} : vector<64x256xf32> to vector<8x256xf32>
    %73 = arith.truncf %71 : vector<8x64xf32> to vector<8x64xbf16>
    %cst_15 = arith.constant dense<0.000000e+00> : vector<8x256xf32>
    %74 = tpu.matmul %73, %6, %cst_15 {dimension_numbers = #tpu.dot_dimension_numbers<[1], [0], [0], [1], [0, 0, 1, 1], [], []>} : vector<8x64xbf16>, vector<64x256xbf16>, vector<8x256xf32> -> vector<8x256xf32>
    %75 = arith.addf %72, %74 : vector<8x256xf32>
    %76 = arith.negf %75 : vector<8x256xf32>
    %77 = math.exp %76 : vector<8x256xf32>
    %cst_16 = arith.constant 1.000000e+00 : f32
    %78 = vector.broadcast %cst_16 : f32 to vector<8x256xf32>
    %79 = arith.addf %78, %77 : vector<8x256xf32>
    %80 = arith.divf %78, %79 : vector<8x256xf32>
    %81 = math.tanh %75 : vector<8x256xf32>
    %82 = arith.select %9, %80, %81 : vector<8x256xi1>, vector<8x256xf32>
    %83 = vector.extract_strided_slice %82 {offsets = [0, 0], sizes = [8, 64], strides = [1, 1]} : vector<8x256xf32> to vector<8x64xf32>
    %84 = vector.extract_strided_slice %82 {offsets = [0, 64], sizes = [8, 64], strides = [1, 1]} : vector<8x256xf32> to vector<8x64xf32>
    %85 = vector.extract_strided_slice %82 {offsets = [0, 128], sizes = [8, 64], strides = [1, 1]} : vector<8x256xf32> to vector<8x64xf32>
    %86 = vector.extract_strided_slice %82 {offsets = [0, 192], sizes = [8, 64], strides = [1, 1]} : vector<8x256xf32> to vector<8x64xf32>
    %87 = arith.mulf %84, %69 : vector<8x64xf32>
    %88 = arith.mulf %83, %86 : vector<8x64xf32>
    %89 = arith.addf %87, %88 : vector<8x64xf32>
    %90 = math.tanh %89 : vector<8x64xf32>
    %91 = arith.mulf %85, %90 : vector<8x64xf32>
    %92 = vector.extract_strided_slice %5 {offsets = [32, 0], sizes = [8, 256], strides = [1, 1]} : vector<64x256xf32> to vector<8x256xf32>
    %93 = arith.truncf %91 : vector<8x64xf32> to vector<8x64xbf16>
    %cst_17 = arith.constant dense<0.000000e+00> : vector<8x256xf32>
    %94 = tpu.matmul %93, %6, %cst_17 {dimension_numbers = #tpu.dot_dimension_numbers<[1], [0], [0], [1], [0, 0, 1, 1], [], []>} : vector<8x64xbf16>, vector<64x256xbf16>, vector<8x256xf32> -> vector<8x256xf32>
    %95 = arith.addf %92, %94 : vector<8x256xf32>
    %96 = arith.negf %95 : vector<8x256xf32>
    %97 = math.exp %96 : vector<8x256xf32>
    %cst_18 = arith.constant 1.000000e+00 : f32
    %98 = vector.broadcast %cst_18 : f32 to vector<8x256xf32>
    %99 = arith.addf %98, %97 : vector<8x256xf32>
    %100 = arith.divf %98, %99 : vector<8x256xf32>
    %101 = math.tanh %95 : vector<8x256xf32>
    %102 = arith.select %9, %100, %101 : vector<8x256xi1>, vector<8x256xf32>
    %103 = vector.extract_strided_slice %102 {offsets = [0, 0], sizes = [8, 64], strides = [1, 1]} : vector<8x256xf32> to vector<8x64xf32>
    %104 = vector.extract_strided_slice %102 {offsets = [0, 64], sizes = [8, 64], strides = [1, 1]} : vector<8x256xf32> to vector<8x64xf32>
    %105 = vector.extract_strided_slice %102 {offsets = [0, 128], sizes = [8, 64], strides = [1, 1]} : vector<8x256xf32> to vector<8x64xf32>
    %106 = vector.extract_strided_slice %102 {offsets = [0, 192], sizes = [8, 64], strides = [1, 1]} : vector<8x256xf32> to vector<8x64xf32>
    %107 = arith.mulf %104, %89 : vector<8x64xf32>
    %108 = arith.mulf %103, %106 : vector<8x64xf32>
    %109 = arith.addf %107, %108 : vector<8x64xf32>
    %110 = math.tanh %109 : vector<8x64xf32>
    %111 = arith.mulf %105, %110 : vector<8x64xf32>
    %112 = vector.extract_strided_slice %5 {offsets = [40, 0], sizes = [8, 256], strides = [1, 1]} : vector<64x256xf32> to vector<8x256xf32>
    %113 = arith.truncf %111 : vector<8x64xf32> to vector<8x64xbf16>
    %cst_19 = arith.constant dense<0.000000e+00> : vector<8x256xf32>
    %114 = tpu.matmul %113, %6, %cst_19 {dimension_numbers = #tpu.dot_dimension_numbers<[1], [0], [0], [1], [0, 0, 1, 1], [], []>} : vector<8x64xbf16>, vector<64x256xbf16>, vector<8x256xf32> -> vector<8x256xf32>
    %115 = arith.addf %112, %114 : vector<8x256xf32>
    %116 = arith.negf %115 : vector<8x256xf32>
    %117 = math.exp %116 : vector<8x256xf32>
    %cst_20 = arith.constant 1.000000e+00 : f32
    %118 = vector.broadcast %cst_20 : f32 to vector<8x256xf32>
    %119 = arith.addf %118, %117 : vector<8x256xf32>
    %120 = arith.divf %118, %119 : vector<8x256xf32>
    %121 = math.tanh %115 : vector<8x256xf32>
    %122 = arith.select %9, %120, %121 : vector<8x256xi1>, vector<8x256xf32>
    %123 = vector.extract_strided_slice %122 {offsets = [0, 0], sizes = [8, 64], strides = [1, 1]} : vector<8x256xf32> to vector<8x64xf32>
    %124 = vector.extract_strided_slice %122 {offsets = [0, 64], sizes = [8, 64], strides = [1, 1]} : vector<8x256xf32> to vector<8x64xf32>
    %125 = vector.extract_strided_slice %122 {offsets = [0, 128], sizes = [8, 64], strides = [1, 1]} : vector<8x256xf32> to vector<8x64xf32>
    %126 = vector.extract_strided_slice %122 {offsets = [0, 192], sizes = [8, 64], strides = [1, 1]} : vector<8x256xf32> to vector<8x64xf32>
    %127 = arith.mulf %124, %109 : vector<8x64xf32>
    %128 = arith.mulf %123, %126 : vector<8x64xf32>
    %129 = arith.addf %127, %128 : vector<8x64xf32>
    %130 = math.tanh %129 : vector<8x64xf32>
    %131 = arith.mulf %125, %130 : vector<8x64xf32>
    %132 = vector.extract_strided_slice %5 {offsets = [48, 0], sizes = [8, 256], strides = [1, 1]} : vector<64x256xf32> to vector<8x256xf32>
    %133 = arith.truncf %131 : vector<8x64xf32> to vector<8x64xbf16>
    %cst_21 = arith.constant dense<0.000000e+00> : vector<8x256xf32>
    %134 = tpu.matmul %133, %6, %cst_21 {dimension_numbers = #tpu.dot_dimension_numbers<[1], [0], [0], [1], [0, 0, 1, 1], [], []>} : vector<8x64xbf16>, vector<64x256xbf16>, vector<8x256xf32> -> vector<8x256xf32>
    %135 = arith.addf %132, %134 : vector<8x256xf32>
    %136 = arith.negf %135 : vector<8x256xf32>
    %137 = math.exp %136 : vector<8x256xf32>
    %cst_22 = arith.constant 1.000000e+00 : f32
    %138 = vector.broadcast %cst_22 : f32 to vector<8x256xf32>
    %139 = arith.addf %138, %137 : vector<8x256xf32>
    %140 = arith.divf %138, %139 : vector<8x256xf32>
    %141 = math.tanh %135 : vector<8x256xf32>
    %142 = arith.select %9, %140, %141 : vector<8x256xi1>, vector<8x256xf32>
    %143 = vector.extract_strided_slice %142 {offsets = [0, 0], sizes = [8, 64], strides = [1, 1]} : vector<8x256xf32> to vector<8x64xf32>
    %144 = vector.extract_strided_slice %142 {offsets = [0, 64], sizes = [8, 64], strides = [1, 1]} : vector<8x256xf32> to vector<8x64xf32>
    %145 = vector.extract_strided_slice %142 {offsets = [0, 128], sizes = [8, 64], strides = [1, 1]} : vector<8x256xf32> to vector<8x64xf32>
    %146 = vector.extract_strided_slice %142 {offsets = [0, 192], sizes = [8, 64], strides = [1, 1]} : vector<8x256xf32> to vector<8x64xf32>
    %147 = arith.mulf %144, %129 : vector<8x64xf32>
    %148 = arith.mulf %143, %146 : vector<8x64xf32>
    %149 = arith.addf %147, %148 : vector<8x64xf32>
    %150 = math.tanh %149 : vector<8x64xf32>
    %151 = arith.mulf %145, %150 : vector<8x64xf32>
    %152 = vector.extract_strided_slice %5 {offsets = [56, 0], sizes = [8, 256], strides = [1, 1]} : vector<64x256xf32> to vector<8x256xf32>
    %153 = arith.truncf %151 : vector<8x64xf32> to vector<8x64xbf16>
    %cst_23 = arith.constant dense<0.000000e+00> : vector<8x256xf32>
    %154 = tpu.matmul %153, %6, %cst_23 {dimension_numbers = #tpu.dot_dimension_numbers<[1], [0], [0], [1], [0, 0, 1, 1], [], []>} : vector<8x64xbf16>, vector<64x256xbf16>, vector<8x256xf32> -> vector<8x256xf32>
    %155 = arith.addf %152, %154 : vector<8x256xf32>
    %156 = arith.negf %155 : vector<8x256xf32>
    %157 = math.exp %156 : vector<8x256xf32>
    %cst_24 = arith.constant 1.000000e+00 : f32
    %158 = vector.broadcast %cst_24 : f32 to vector<8x256xf32>
    %159 = arith.addf %158, %157 : vector<8x256xf32>
    %160 = arith.divf %158, %159 : vector<8x256xf32>
    %161 = math.tanh %155 : vector<8x256xf32>
    %162 = arith.select %9, %160, %161 : vector<8x256xi1>, vector<8x256xf32>
    %163 = vector.extract_strided_slice %162 {offsets = [0, 0], sizes = [8, 64], strides = [1, 1]} : vector<8x256xf32> to vector<8x64xf32>
    %164 = vector.extract_strided_slice %162 {offsets = [0, 64], sizes = [8, 64], strides = [1, 1]} : vector<8x256xf32> to vector<8x64xf32>
    %165 = vector.extract_strided_slice %162 {offsets = [0, 128], sizes = [8, 64], strides = [1, 1]} : vector<8x256xf32> to vector<8x64xf32>
    %166 = vector.extract_strided_slice %162 {offsets = [0, 192], sizes = [8, 64], strides = [1, 1]} : vector<8x256xf32> to vector<8x64xf32>
    %167 = arith.mulf %164, %149 : vector<8x64xf32>
    %168 = arith.mulf %163, %166 : vector<8x64xf32>
    %169 = arith.addf %167, %168 : vector<8x64xf32>
    %170 = math.tanh %169 : vector<8x64xf32>
    %171 = arith.mulf %165, %170 : vector<8x64xf32>
    %172 = arith.truncf %171 : vector<8x64xf32> to vector<8x64xbf16>
    %c0_25 = arith.constant 0 : index
    %c0_26 = arith.constant 0 : index
    %173 = vector.load %arg4[%c0_25, %c0_26] : memref<64x128xbf16, #tpu.memory_space<vmem>>, vector<64x128xbf16>
    %cst_27 = arith.constant dense<0.000000e+00> : vector<8x128xf32>
    %174 = tpu.matmul %172, %173, %cst_27 {dimension_numbers = #tpu.dot_dimension_numbers<[1], [0], [0], [1], [0, 0, 1, 1], [], []>} : vector<8x64xbf16>, vector<64x128xbf16>, vector<8x128xf32> -> vector<8x128xf32>
    %c0_28 = arith.constant 0 : index
    %c0_29 = arith.constant 0 : index
    %175 = vector.load %arg5[%c0_28, %c0_29] : memref<1x128xf32, #tpu.memory_space<vmem>>, vector<1x128xf32>
    %176 = vector.broadcast %175 : vector<1x128xf32> to vector<8x128xf32>
    %177 = arith.addf %174, %176 : vector<8x128xf32>
    %c0_30 = arith.constant 0 : index
    %c0_31 = arith.constant 0 : index
    %178 = vector.load %arg6[%c0_30, %c0_31] : memref<8x128xf32, #tpu.memory_space<vmem>>, vector<8x128xf32>
    tpu.vector_store %arg6[%c0_30, %c0_31], %177 {strides = array<i32>} : memref<8x128xf32, #tpu.memory_space<vmem>>, vector<8x128xf32>,
    return
  }
}

</mosaic_0001>

<bundles_post_ra>
// kernel: lstm_model_forward.1
= control target key start
LH: loop header
LB: loop body
LE: loop exit
PB: predicated region body
PF: predicated region fallthrough
CT: control target
= control target key end

     0   :  { %11 = vsyncpa [#allocation3], 0  ;;  %s1171_s21 = smov [#allocation2]   ;;  %s1475_s0 = inlined_call_operand.vmem [shape: bf16[64,16], index: 0, kind: input, shape index: {}]   ;;  %s1476_s1 = inlined_call_operand.vmem [shape: bf16[16,256], index: 1, kind: input, shape index: {}]   ;;  %s1477_s2 = inlined_call_operand.vmem [shape: bf16[64,256], index: 2, kind: input, shape index: {}]   ;;  %s1478_s3 = inlined_call_operand.vmem [shape: f32[1,256], index: 3, kind: input, shape index: {}]   ;;  %s1479_s4 = inlined_call_operand.hbm [shape: bf16[64,128], index: 4, kind: input, shape index: {}]   ;;  %s1480_s5 = inlined_call_operand.vmem [shape: f32[1,128], index: 5, kind: input, shape index: {}]   ;;  %s1481_s6 = inlined_call_operand.vmem [shape: f32[8,128], index: 6, kind: output, shape index: {}]  }
   0x1   :  { %s25_s22 = sshll.u32 %s1171_s21, 4  ;;  %s1147_s25 = scalar_lea.hbm %s1479_s4, 512  ;;  %s26_s22 = int_to_ptr.vmem [resolvable:$true] %s25_s22 }
   0x2   :  { %p1148_p0 = scmp.ne.s32.totalorder %s1479_s4, %s1147_s25  ;;  %p1151_p1 = scmp.lt.u32.totalorder %s1147_s25, %s1479_s4 }
   0x4   :  { %p1153_p2 = pnand %p1151_p1, %p1148_p0 }
   0x6   :  { %1156 = shalt.err (!%p1153_p2)
}
   0x7   :  { %s1157_s30 = scalar_lea.vmem %s26_s22, 512  ;;  %p1162_p4 = scmp.lt.s32.totalorder %s26_s22, %s26_s22 }
   0x8   :  { %p1158_p3 = scmp.ne.s32.totalorder %s26_s22, %s1157_s30  ;;  %p1163_p5 = scmp.lt.s32.totalorder %s1157_s30, %s1157_s30 }
   0xa   :  { %p1164_p6 = por %p1163_p5, %p1162_p4 }
   0xc   :  { %p1165_p7 = pnand %p1164_p6, %p1158_p3 }
   0xe   :  { %1168 = shalt.err (!%p1165_p7)
}
   0xf   :  { %s1172_s7 = smov 64   ;;  %s1173_s8 = smov 4  }
  0x10   :  { %31 = dma.hbm_to_vmem [thread:$0]  %s1479_s4, 512, %s26_s22, [#allocation3], %s1172_s7, %s1172_s7, %s1173_s8  }
  0x11   :  { %1169 = dma.done.wait [#allocation3], 512  }
  0x12   :  { %1170 = vsyncadd [#allocation3], 4294966784  ;;  %v1174_v0 = vmov 0   ;;  %v1231_v1 = vld [vmem:[%s1477_s2 + $0x4] ss:$8 sps:$4 sm:$0xff]   ;;  %vm90_vm0 = vcmask 130048   ;;  %v50_v12 = vlaneseq }
  0x13   :  { %135 = vmatprep.mubr.bf16.mxu0 %v1174_v0  ;;  %265 = vmatprep.mubr.bf16.mxu1 %v1174_v0  ;;  %v1236_v2 = vld [vmem:[%s1477_s2] ss:$8 sps:$4 sm:$0xff]   ;;  %v1242_v3 = vld [vmem:[%s1477_s2 + $0x14] ss:$8 sps:$4 sm:$0xff]   ;;  %v1247_v4 = vld [vmem:[%s1477_s2 + $0x10] ss:$8 sps:$4 sm:$0xff]  }
  0x14   :  { %233 = vmatprep.subr.bf16.mxu1 %v1231_v1  ;;  %v1034_v5 = vld [vmem:[%s1476_s1 + $0x4] ss:$8 sps:$4 sm:$0xff]   ;;  %v1036_v6 = vld [vmem:[%s1476_s1] ss:$8 sps:$4 sm:$0xff]   ;;  %v1274_v10 = vld [vmem:[%s1477_s2 + $0x34] ss:$8 sps:$4 sm:$0xff]  }
  0x15   :  { %234 = vmatpush1.bf16.msra.mxu1 %v1236_v2  ;;  %v1260_v7 = vld [vmem:[%s1477_s2 + $0x24] ss:$8 sps:$4 sm:$0xff]   ;;  %103 = vmatprep.subr.bf16.mxu0 %v1034_v5  ;;  %v1269_v9 = vld [vmem:[%s1477_s2 + $0x20] ss:$8 sps:$4 sm:$0xff]   ;;  %v1282_v11 = vld [vmem:[%s1477_s2 + $0x30] ss:$8 sps:$4 sm:$0xff]  }
  0x16   :  { %235 = vmatprep.subr.bf16.mxu1 %v1242_v3  ;;  %104 = vmatpush1.bf16.msra.mxu0 %v1036_v6  ;;  %v1040_v8 = vld [vmem:[%s1475_s0] sm:$0xff]   ;;  %v51_v13 = vshrl.u32 %v50_v12, 7  ;;  %v185_v34 = vand.u32 127, %v50_v12  ;;  %vm229_vm2 = vcmask 523264   ;;  %vm1176_vm3 = vmmov 0  }
  0x17   :  { %393 = vmatprep.subr.bf16.mxu0 %v1231_v1  ;;  %v48_v15 = vld [vmem:[%s1478_s3] sm:$0x3] }
  0x18   :  { %v52_v14 = vsub.s32 0, %v51_v13  ;;  %v56_v16 = vsub.s32 1, %v51_v13  ;;  %v1316_v35 = vadd.s32 128, %v185_v34 }
  0x19   :  { %236 = vmatpush1.bf16.msra.mxu1 %v1247_v4  ;;  %964 = vmatmul.mubr.msk.bf16.vlgmr.msra.gmra.mrb[0].mxu0 %vm90_vm0, %v1040_v8 }
  0x1a   :  { %237 = vmatprep.subr.bf16.mxu1 %v1260_v7  ;;  %394 = vmatpush1.bf16.msra.mxu0 %v1236_v2  ;;  %v1310_v19 = vrot.slane %v48_v15, %v52_v14  ;;  %v1312_v21 = vrot.slane %v48_v15, %v56_v16  ;;  %vm188_vm1 = vcmp.lt.s32.totalorder %v1316_v35, 192  ;;  %v1049_v35 = vld [vmem:[#allocation2 + $0x10] sm:$0xff]  }
  0x1b   :  { %145 = vmatprep.mubr.bf16.mxu0 %v1174_v0  ;;  %395 = vmatprep.subr.bf16.mxu0 %v1242_v3 }
  0x1d   :  { %238 = vmatpush1.bf16.msra.mxu1 %v1269_v9 }
  0x1e   :  { %239 = vmatprep.subr.bf16.mxu1 %v1274_v10  ;;  %396 = vmatpush1.bf16.msra.mxu0 %v1247_v4 }
  0x1f   :  { %397 = vmatprep.subr.bf16.mxu0 %v1260_v7 }
  0x21   :  { %240 = vmatpush1.bf16.msra.mxu1 %v1282_v11 }
  0x22   :  { %313 = vmatprep.subr.bf16.mxu1 %v1231_v1  ;;  %398 = vmatpush1.bf16.msra.mxu0 %v1269_v9 }
  0x23   :  { %399 = vmatprep.subr.bf16.mxu0 %v1274_v10 }
  0x24   :  { %266 = vmatmul.mubr.bf16.vlgmr.msra.gmra.mrb[0].mxu1 %v1174_v0 }
  0x25   :  { %314 = vmatpush1.bf16.msra.mxu1 %v1236_v2  ;;  %345 = vmatprep.mubr.bf16.mxu1 %v1174_v0 }
  0x26   :  { %315 = vmatprep.subr.bf16.mxu1 %v1242_v3  ;;  %400 = vmatpush1.bf16.msra.mxu0 %v1282_v11 }
  0x27   :  { %553 = vmatprep.subr.bf16.mxu0 %v1231_v1 }
  0x29   :  { %316 = vmatpush1.bf16.msra.mxu1 %v1247_v4 }
  0x2a   :  { %317 = vmatprep.subr.bf16.mxu1 %v1260_v7 }
  0x2d   :  { %318 = vmatpush1.bf16.msra.mxu1 %v1269_v9 }
  0x2e   :  { %319 = vmatprep.subr.bf16.mxu1 %v1274_v10 }
  0x31   :  { %320 = vmatpush1.bf16.msra.mxu1 %v1282_v11 }
  0x32   :  { %473 = vmatprep.subr.bf16.mxu1 %v1231_v1 }
  0xec   :  { %v137_v17 = vpop.f32.mrb[0].mxu0 }
  0xed   :  { %v139_v18 = vpop.f32.mrb[1].mxu0  ;;  %v138_v23 = vadd.f32 %v137_v17, %v1310_v19  ;;  %v1044_v17 = vld [vmem:[%s1475_s0 + $0x8] sm:$0xff]  }
  0xee   :  { %v141_v20 = vpop.f32.mrb[2].mxu0  ;;  %v140_v24 = vadd.f32 %v139_v18, %v1312_v21  ;;  %965 = vmatmul.mubr.msk.bf16.gmra.mrb[4].mxu0 %vm90_vm0, %v1044_v17  ;;  %v1045_v18 = vld [vmem:[%s1475_s0 + $0x10] sm:$0xff]  }
  0xef   :  { %v143_v22 = vpop.f32.mrb[3].mxu0  ;;  %v142_v52 = vadd.f32 %v141_v20, %v1310_v19  ;;  %155 = vmatprep.mubr.bf16.mxu0 %v1174_v0  ;;  %v1046_v20 = vld [vmem:[%s1475_s0 + $0x18] sm:$0xff]  }
  0xf0   :  { %v144_v53 = vadd.f32 %v143_v22, %v1312_v21 }
  0xf6   :  { %966 = vmatmul.mubr.msk.bf16.gmra.mrb[8].mxu0 %vm90_vm0, %v1045_v18 }
  0xf7   :  { %v267_v25 = vpop.f32.mrb[0].mxu1  ;;  %165 = vmatprep.mubr.bf16.mxu0 %v1174_v0 }
  0xf8   :  { %v274_v26 = vadd.f32 %v267_v25, %v138_v23  ;;  %v269_v27 = vpop.f32.mrb[1].mxu1 }
  0xf9   :  { %v275_v28 = vadd.f32 %v269_v27, %v140_v24  ;;  %v271_v29 = vpop.f32.mrb[2].mxu1 }
  0xfa   :  { %v272_v30 = vpop.f32.mrb[3].mxu1  ;;  %v976_v39 = vmul.f32 -1.442695, %v274_v26 }
  0xfb   :  { %v977_v31 = vmul.f32 -1.442695, %v275_v28 }
  0xfd   :  { %1051 = vpow2.f32 %v977_v31 }
  0xfe   :  { %1053 = vtanh.f32 %v275_v28  ;;  %967 = vmatmul.mubr.msk.bf16.gmra.mrb[12].mxu0 %vm90_vm0, %v1046_v20 }
  0xff   :  { %425 = vmatprep.mubr.bf16.mxu0 %v1174_v0 }
 0x107   :  { %v1052_v32 = vpop.eup %1051 }
 0x108   :  { %v283_v33 = vadd.f32 1.0, %v1052_v32  ;;  %v1054_v36 = vpop.eup %1053 }
 0x10a   :  { %1055 = vrcp.f32 %v283_v33 }
 0x10b   :  { %1057 = vpow2.f32 %v976_v39 }
 0x114   :  { %v1056_v37 = vpop.eup %1055 }
 0x115   :  { %v291_v38 = vsel %vm188_vm1, %v1056_v37, %v1054_v36  ;;  %v1058_v40 = vpop.eup %1057 }
 0x116   :  { %294 = vrot.lane.b32.xlu0 %v291_v38, %s1172_s7  ;;  %v282_v41 = vadd.f32 1.0, %v1058_v40 }
 0x118   :  { %1059 = vrcp.f32 %v282_v41 }
 0x122   :  { %v1060_v42 = vpop.eup %1059 }
 0x123   :  { %v292_v45 = vmul.f32 0.0, %v1060_v42 }
 0x188   :  { %v295_v43 = vpop.permute.xlu0 %294 }
 0x189   :  { %v297_v44 = vmul.f32 %v1060_v42, %v295_v43 }
 0x18b   :  { %299 = vrot.lane.b32.xlu0 %v297_v44, %s1172_s7 }
 0x1c1   :  { %v147_v26 = vpop.f32.mrb[4].mxu0 }
 0x1c2   :  { %v149_v27 = vpop.f32.mrb[5].mxu0  ;;  %v148_v42 = vadd.f32 %v147_v26, %v1310_v19 }
 0x1c3   :  { %v1356_v28 = vpop.f32.mrb[6].mxu0  ;;  %v150_v43 = vadd.f32 %v149_v27, %v1312_v21 }
 0x1c4   :  { %v1358_v29 = vpop.f32.mrb[7].mxu0 }
 0x1c9   :  { %v1360_v30 = vpop.f32.mrb[8].mxu0 }
 0x1ca   :  { %v1362_v31 = vpop.f32.mrb[9].mxu0 }
 0x1cb   :  { %v1364_v32 = vpop.f32.mrb[10].mxu0 }
 0x1cc   :  { %v1366_v33 = vpop.f32.mrb[11].mxu0 }
 0x1d1   :  { %v1368_v34 = vpop.f32.mrb[12].mxu0 }
 0x1d2   :  { %v1370_v36 = vpop.f32.mrb[13].mxu0 }
 0x1d3   :  { %v1372_v37 = vpop.f32.mrb[14].mxu0 }
 0x1fd   :  { %v300_v46 = vpop.permute.xlu0 %299 }
 0x1fe   :  { %v302_v47 = vadd.f32 %v300_v46, %v292_v45 }
 0x200   :  { %1061 = vtanh.f32 %v302_v47 }
 0x20a   :  { %v1062_v48 = vpop.eup %1061 }
 0x20b   :  { %305 = vrot.lane.b32.xlu1 %v1062_v48, %s1172_s7 }
 0x27d   :  { %v306_v49 = vpop.permute.xlu1 %305 }
 0x27e   :  { %v308_v50 = vmul.f32 %v306_v49, %v291_v38  ;;  %v1374_v38 = vpop.f32.mrb[15].mxu0 }
 0x280   :  { %v309_v51 = vpack.c.bf16 %v308_v50, %v308_v50 }
 0x282   :  { %978 = vmatmul.mubr.msk.bf16.vlgmr.msra.gmra.mrb[4].mxu1 %vm229_vm2, %v309_v51 }
 0x283   :  { %474 = vmatpush1.bf16.msra.mxu1 %v1236_v2  ;;  %505 = vmatprep.mubr.bf16.mxu1 %v1174_v0 }
 0x284   :  { %475 = vmatprep.subr.bf16.mxu1 %v1242_v3 }
 0x287   :  { %476 = vmatpush1.bf16.msra.mxu1 %v1247_v4 }
 0x288   :  { %477 = vmatprep.subr.bf16.mxu1 %v1260_v7 }
 0x28b   :  { %478 = vmatpush1.bf16.msra.mxu1 %v1269_v9 }
 0x28c   :  { %479 = vmatprep.subr.bf16.mxu1 %v1274_v10 }
 0x28f   :  { %480 = vmatpush1.bf16.msra.mxu1 %v1282_v11 }
 0x290   :  { %633 = vmatprep.subr.bf16.mxu1 %v1231_v1 }
 0x355   :  { %v347_v54 = vpop.f32.mrb[4].mxu1 }
 0x356   :  { %v354_v55 = vadd.f32 %v347_v54, %v142_v52  ;;  %v349_v56 = vpop.f32.mrb[5].mxu1 }
 0x357   :  { %v355_v57 = vadd.f32 %v349_v56, %v144_v53  ;;  %v351_v58 = vpop.f32.mrb[6].mxu1 }
 0x358   :  { %v352_v59 = vpop.f32.mrb[7].mxu1  ;;  %v979_v8 = vmul.f32 -1.442695, %v354_v55 }
 0x359   :  { %v980_v60 = vmul.f32 -1.442695, %v355_v57 }
 0x35b   :  { %1063 = vpow2.f32 %v980_v60 }
 0x35c   :  { %1065 = vtanh.f32 %v355_v57 }
 0x365   :  { %v1064_v61 = vpop.eup %1063 }
 0x366   :  { %v363_v62 = vadd.f32 1.0, %v1064_v61  ;;  %v1066_v63 = vpop.eup %1065 }
 0x368   :  { %1067 = vrcp.f32 %v363_v62 }
 0x369   :  { %1069 = vpow2.f32 %v979_v8 }
 0x372   :  { %v1068_v5 = vpop.eup %1067 }
 0x373   :  { %v371_v6 = vsel %vm188_vm1, %v1068_v5, %v1066_v63  ;;  %v1070_v12 = vpop.eup %1069 }
 0x374   :  { %374 = vrot.lane.b32.xlu1 %v371_v6, %s1172_s7  ;;  %v362_v13 = vadd.f32 1.0, %v1070_v12 }
 0x376   :  { %1071 = vrcp.f32 %v362_v13 }
 0x380   :  { %v1072_v14 = vpop.eup %1071 }
 0x381   :  { %v372_v22 = vmul.f32 %v1072_v14, %v302_v47 }
 0x3e6   :  { %v375_v15 = vpop.permute.xlu1 %374 }
 0x3e7   :  { %v377_v16 = vmul.f32 %v1072_v14, %v375_v15  ;;  %v152_v14 = vadd.f32 %v1356_v28, %v1310_v19  ;;  %v154_v15 = vadd.f32 %v1358_v29, %v1312_v21 }
 0x3e9   :  { %379 = vrot.lane.b32.xlu0 %v377_v16, %s1172_s7 }
 0x45b   :  { %v380_v23 = vpop.permute.xlu0 %379 }
 0x45c   :  { %v382_v24 = vadd.f32 %v380_v23, %v372_v22 }
 0x45e   :  { %1073 = vtanh.f32 %v382_v24 }
 0x468   :  { %v1074_v25 = vpop.eup %1073 }
 0x469   :  { %385 = vrot.lane.b32.xlu1 %v1074_v25, %s1172_s7 }
 0x4db   :  { %v386_v39 = vpop.permute.xlu1 %385 }
 0x4dc   :  { %v388_v40 = vmul.f32 %v386_v39, %v371_v6 }
 0x4de   :  { %v389_v41 = vpack.c.bf16 %v388_v40, %v388_v40 }
 0x4e0   :  { %981 = vmatmul.mubr.msk.bf16.vlgmr.msra.gmra.mrb[16].mxu0 %vm229_vm2, %v389_v41 }
 0x4e1   :  { %554 = vmatpush1.bf16.msra.mxu0 %v1236_v2  ;;  %585 = vmatprep.mubr.bf16.mxu0 %v1174_v0 }
 0x4e2   :  { %555 = vmatprep.subr.bf16.mxu0 %v1242_v3 }
 0x4e5   :  { %556 = vmatpush1.bf16.msra.mxu0 %v1247_v4 }
 0x4e6   :  { %557 = vmatprep.subr.bf16.mxu0 %v1260_v7 }
 0x4e9   :  { %558 = vmatpush1.bf16.msra.mxu0 %v1269_v9 }
 0x4ea   :  { %559 = vmatprep.subr.bf16.mxu0 %v1274_v10 }
 0x4ed   :  { %560 = vmatpush1.bf16.msra.mxu0 %v1282_v11 }
 0x4ee   :  { %713 = vmatprep.subr.bf16.mxu0 %v1231_v1 }
 0x5b3   :  { %v427_v44 = vpop.f32.mrb[16].mxu0 }
 0x5b4   :  { %v434_v45 = vadd.f32 %v427_v44, %v148_v42  ;;  %v429_v46 = vpop.f32.mrb[17].mxu0 }
 0x5b5   :  { %v435_v47 = vadd.f32 %v429_v46, %v150_v43  ;;  %v431_v48 = vpop.f32.mrb[18].mxu0 }
 0x5b6   :  { %v432_v49 = vpop.f32.mrb[19].mxu0  ;;  %v982_v56 = vmul.f32 -1.442695, %v434_v45 }
 0x5b7   :  { %v983_v50 = vmul.f32 -1.442695, %v435_v47 }
 0x5b9   :  { %1075 = vpow2.f32 %v983_v50 }
 0x5ba   :  { %1077 = vtanh.f32 %v435_v47 }
 0x5c3   :  { %v1076_v51 = vpop.eup %1075 }
 0x5c4   :  { %v443_v52 = vadd.f32 1.0, %v1076_v51  ;;  %v1078_v53 = vpop.eup %1077  ;;  %v158_v51 = vadd.f32 %v1360_v30, %v1310_v19 }
 0x5c6   :  { %1079 = vrcp.f32 %v443_v52  ;;  %v160_v52 = vadd.f32 %v1362_v31, %v1312_v21 }
 0x5c7   :  { %1081 = vpow2.f32 %v982_v56 }
 0x5d0   :  { %v1080_v54 = vpop.eup %1079 }
 0x5d1   :  { %v451_v55 = vsel %vm188_vm1, %v1080_v54, %v1078_v53  ;;  %v1082_v57 = vpop.eup %1081 }
 0x5d2   :  { %454 = vrot.lane.b32.xlu0 %v451_v55, %s1172_s7  ;;  %v442_v58 = vadd.f32 1.0, %v1082_v57 }
 0x5d4   :  { %1083 = vrcp.f32 %v442_v58 }
 0x5de   :  { %v1084_v59 = vpop.eup %1083 }
 0x5df   :  { %v452_v62 = vmul.f32 %v1084_v59, %v382_v24 }
 0x644   :  { %v455_v60 = vpop.permute.xlu0 %454 }
 0x645   :  { %v457_v61 = vmul.f32 %v1084_v59, %v455_v60 }
 0x647   :  { %459 = vrot.lane.b32.xlu1 %v457_v61, %s1172_s7 }
 0x6b9   :  { %v460_v63 = vpop.permute.xlu1 %459 }
 0x6ba   :  { %v462_v5 = vadd.f32 %v460_v63, %v452_v62 }
 0x6bc   :  { %1085 = vtanh.f32 %v462_v5 }
 0x6c6   :  { %v1086_v6 = vpop.eup %1085 }
 0x6c7   :  { %465 = vrot.lane.b32.xlu0 %v1086_v6, %s1172_s7 }
 0x739   :  { %v466_v8 = vpop.permute.xlu0 %465 }
 0x73a   :  { %v468_v12 = vmul.f32 %v466_v8, %v451_v55 }
 0x73c   :  { %v469_v13 = vpack.c.bf16 %v468_v12, %v468_v12 }
 0x73e   :  { %984 = vmatmul.mubr.msk.bf16.vlgmr.msra.gmra.mrb[8].mxu1 %vm229_vm2, %v469_v13 }
 0x73f   :  { %634 = vmatpush1.bf16.msra.mxu1 %v1236_v2  ;;  %665 = vmatprep.mubr.bf16.mxu1 %v1174_v0 }
 0x740   :  { %635 = vmatprep.subr.bf16.mxu1 %v1242_v3 }
 0x743   :  { %636 = vmatpush1.bf16.msra.mxu1 %v1247_v4 }
 0x744   :  { %637 = vmatprep.subr.bf16.mxu1 %v1260_v7 }
 0x747   :  { %638 = vmatpush1.bf16.msra.mxu1 %v1269_v9 }
 0x748   :  { %639 = vmatprep.subr.bf16.mxu1 %v1274_v10 }
 0x74b   :  { %640 = vmatpush1.bf16.msra.mxu1 %v1282_v11 }
 0x74c   :  { %793 = vmatprep.subr.bf16.mxu1 %v1231_v1 }
 0x811   :  { %v507_v16 = vpop.f32.mrb[8].mxu1 }
 0x812   :  { %v514_v17 = vadd.f32 %v507_v16, %v152_v14  ;;  %v509_v18 = vpop.f32.mrb[9].mxu1 }
 0x813   :  { %v515_v20 = vadd.f32 %v509_v18, %v154_v15  ;;  %v511_v22 = vpop.f32.mrb[10].mxu1 }
 0x814   :  { %v512_v23 = vpop.f32.mrb[11].mxu1  ;;  %v985_v29 = vmul.f32 -1.442695, %v514_v17 }
 0x815   :  { %v986_v24 = vmul.f32 -1.442695, %v515_v20  ;;  %v162_v23 = vadd.f32 %v1364_v32, %v1310_v19 }
 0x817   :  { %1087 = vpow2.f32 %v986_v24 }
 0x818   :  { %1089 = vtanh.f32 %v515_v20 }
 0x821   :  { %v1088_v25 = vpop.eup %1087 }
 0x822   :  { %v523_v26 = vadd.f32 1.0, %v1088_v25  ;;  %v1090_v27 = vpop.eup %1089 }
 0x824   :  { %1091 = vrcp.f32 %v523_v26 }
 0x825   :  { %1093 = vpow2.f32 %v985_v29 }
 0x82e   :  { %v1092_v1 = vpop.eup %1091 }
 0x82f   :  { %v531_v28 = vsel %vm188_vm1, %v1092_v1, %v1090_v27  ;;  %v1094_v39 = vpop.eup %1093 }
 0x830   :  { %534 = vrot.lane.b32.xlu1 %v531_v28, %s1172_s7  ;;  %v522_v40 = vadd.f32 1.0, %v1094_v39 }
 0x832   :  { %1095 = vrcp.f32 %v522_v40 }
 0x83c   :  { %v1096_v41 = vpop.eup %1095 }
 0x83d   :  { %v532_v44 = vmul.f32 %v1096_v41, %v462_v5 }
 0x8a2   :  { %v535_v42 = vpop.permute.xlu1 %534 }
 0x8a3   :  { %v537_v43 = vmul.f32 %v1096_v41, %v535_v42 }
 0x8a5   :  { %539 = vrot.lane.b32.xlu0 %v537_v43, %s1172_s7 }
 0x917   :  { %v540_v45 = vpop.permute.xlu0 %539 }
 0x918   :  { %v542_v46 = vadd.f32 %v540_v45, %v532_v44 }
 0x91a   :  { %1097 = vtanh.f32 %v542_v46 }
 0x924   :  { %v1098_v47 = vpop.eup %1097 }
 0x925   :  { %545 = vrot.lane.b32.xlu1 %v1098_v47, %s1172_s7 }
 0x997   :  { %v546_v48 = vpop.permute.xlu1 %545 }
 0x998   :  { %v548_v49 = vmul.f32 %v546_v48, %v531_v28  ;;  %v168_v48 = vadd.f32 %v1368_v34, %v1310_v19 }
 0x99a   :  { %v549_v50 = vpack.c.bf16 %v548_v49, %v548_v49  ;;  %v170_v49 = vadd.f32 %v1370_v36, %v1312_v21 }
 0x99c   :  { %987 = vmatmul.mubr.msk.bf16.vlgmr.msra.gmra.mrb[20].mxu0 %vm229_vm2, %v549_v50 }
 0x99d   :  { %714 = vmatpush1.bf16.msra.mxu0 %v1236_v2  ;;  %745 = vmatprep.mubr.bf16.mxu0 %v1174_v0 }
 0x99e   :  { %715 = vmatprep.subr.bf16.mxu0 %v1242_v3 }
 0x9a1   :  { %716 = vmatpush1.bf16.msra.mxu0 %v1247_v4 }
 0x9a2   :  { %717 = vmatprep.subr.bf16.mxu0 %v1260_v7 }
 0x9a5   :  { %718 = vmatpush1.bf16.msra.mxu0 %v1269_v9 }
 0x9a6   :  { %719 = vmatprep.subr.bf16.mxu0 %v1274_v10 }
 0x9a9   :  { %720 = vmatpush1.bf16.msra.mxu0 %v1282_v11 }
 0xa6f   :  { %v587_v53 = vpop.f32.mrb[20].mxu0 }
 0xa70   :  { %v594_v54 = vadd.f32 %v587_v53, %v158_v51  ;;  %v589_v55 = vpop.f32.mrb[21].mxu0 }
 0xa71   :  { %v595_v56 = vadd.f32 %v589_v55, %v160_v52  ;;  %v591_v57 = vpop.f32.mrb[22].mxu0 }
 0xa72   :  { %v592_v58 = vpop.f32.mrb[23].mxu0  ;;  %v988_v31 = vmul.f32 -1.442695, %v594_v54 }
 0xa73   :  { %v989_v59 = vmul.f32 -1.442695, %v595_v56 }
 0xa75   :  { %1099 = vpow2.f32 %v989_v59 }
 0xa76   :  { %1101 = vtanh.f32 %v595_v56 }
 0xa7f   :  { %v1100_v60 = vpop.eup %1099 }
 0xa80   :  { %v603_v61 = vadd.f32 1.0, %v1100_v60  ;;  %v1102_v62 = vpop.eup %1101 }
 0xa82   :  { %1103 = vrcp.f32 %v603_v61 }
 0xa83   :  { %1105 = vpow2.f32 %v988_v31 }
 0xa8c   :  { %v1104_v63 = vpop.eup %1103 }
 0xa8d   :  { %v611_v30 = vsel %vm188_vm1, %v1104_v63, %v1102_v62  ;;  %v1106_v5 = vpop.eup %1105 }
 0xa8e   :  { %614 = vrot.lane.b32.xlu0 %v611_v30, %s1172_s7  ;;  %v602_v6 = vadd.f32 1.0, %v1106_v5 }
 0xa90   :  { %1107 = vrcp.f32 %v602_v6 }
 0xa9a   :  { %v1108_v8 = vpop.eup %1107 }
 0xa9b   :  { %v612_v14 = vmul.f32 %v1108_v8, %v542_v46 }
 0xb00   :  { %v615_v12 = vpop.permute.xlu0 %614 }
 0xb01   :  { %v617_v13 = vmul.f32 %v1108_v8, %v615_v12 }
 0xb03   :  { %619 = vrot.lane.b32.xlu1 %v617_v13, %s1172_s7 }
 0xb75   :  { %v620_v15 = vpop.permute.xlu1 %619 }
 0xb76   :  { %v622_v16 = vadd.f32 %v620_v15, %v612_v14 }
 0xb78   :  { %1109 = vtanh.f32 %v622_v16 }
 0xb82   :  { %v1110_v17 = vpop.eup %1109 }
 0xb83   :  { %625 = vrot.lane.b32.xlu0 %v1110_v17, %s1172_s7  ;;  %v174_v17 = vadd.f32 %v1374_v38, %v1312_v21 }
 0xbf5   :  { %v626_v18 = vpop.permute.xlu0 %625 }
 0xbf6   :  { %v628_v20 = vmul.f32 %v626_v18, %v611_v30 }
 0xbf8   :  { %v629_v22 = vpack.c.bf16 %v628_v20, %v628_v20 }
 0xbfa   :  { %990 = vmatmul.mubr.msk.bf16.vlgmr.msra.gmra.mrb[12].mxu1 %vm229_vm2, %v629_v22 }
 0xbfb   :  { %794 = vmatpush1.bf16.msra.mxu1 %v1236_v2  ;;  %825 = vmatprep.mubr.bf16.mxu1 %v1174_v0  ;;  %v164_v2 = vadd.f32 %v1366_v33, %v1312_v21 }
 0xbfc   :  { %795 = vmatprep.subr.bf16.mxu1 %v1242_v3 }
 0xbff   :  { %796 = vmatpush1.bf16.msra.mxu1 %v1247_v4 }
 0xc00   :  { %797 = vmatprep.subr.bf16.mxu1 %v1260_v7 }
 0xc03   :  { %798 = vmatpush1.bf16.msra.mxu1 %v1269_v9 }
 0xc04   :  { %799 = vmatprep.subr.bf16.mxu1 %v1274_v10 }
 0xc07   :  { %800 = vmatpush1.bf16.msra.mxu1 %v1282_v11 }
 0xccd   :  { %v667_v24 = vpop.f32.mrb[12].mxu1 }
 0xcce   :  { %v674_v0 = vadd.f32 %v667_v24, %v162_v23  ;;  %v669_v25 = vpop.f32.mrb[13].mxu1 }
 0xccf   :  { %v675_v3 = vadd.f32 %v669_v25, %v164_v2  ;;  %v671_v26 = vpop.f32.mrb[14].mxu1 }
 0xcd0   :  { %v672_v4 = vpop.f32.mrb[15].mxu1  ;;  %v991_v33 = vmul.f32 -1.442695, %v674_v0 }
 0xcd1   :  { %v992_v27 = vmul.f32 -1.442695, %v675_v3 }
 0xcd3   :  { %1111 = vpow2.f32 %v992_v27 }
 0xcd4   :  { %1113 = vtanh.f32 %v675_v3 }
 0xcdd   :  { %v1112_v7 = vpop.eup %1111 }
 0xcde   :  { %v683_v9 = vadd.f32 1.0, %v1112_v7  ;;  %v1114_v10 = vpop.eup %1113 }
 0xce0   :  { %1115 = vrcp.f32 %v683_v9 }
 0xce1   :  { %1117 = vpow2.f32 %v991_v33 }
 0xcea   :  { %v1116_v11 = vpop.eup %1115 }
 0xceb   :  { %v691_v32 = vsel %vm188_vm1, %v1116_v11, %v1114_v10  ;;  %v1118_v1 = vpop.eup %1117  ;;  %v1047_v10 = vld [vmem:[#allocation2] sm:$0xff]   ;;  %v1175_v11 = vmov 0.0  }
 0xcec   :  { %694 = vrot.lane.b32.xlu1 %v691_v32, %s1172_s7  ;;  %v682_v28 = vadd.f32 1.0, %v1118_v1  ;;  %1010 = vmatprep.subr.bf16.mxu0 %v1175_v11 }
 0xcee   :  { %1119 = vrcp.f32 %v682_v28  ;;  %v1050_v28 = vld [vmem:[#allocation2 + $0x18] sm:$0xff]  }
 0xcf8   :  { %v1120_v29 = vpop.eup %1119 }
 0xcf9   :  { %v692_v41 = vmul.f32 %v1120_v29, %v622_v16  ;;  %v172_v16 = vadd.f32 %v1372_v37, %v1310_v19 }
 0xd5e   :  { %v695_v39 = vpop.permute.xlu1 %694 }
 0xd5f   :  { %v697_v40 = vmul.f32 %v1120_v29, %v695_v39 }
 0xd61   :  { %699 = vrot.lane.b32.xlu0 %v697_v40, %s1172_s7 }
 0xdd3   :  { %v700_v42 = vpop.permute.xlu0 %699 }
 0xdd4   :  { %v702_v43 = vadd.f32 %v700_v42, %v692_v41 }
 0xdd6   :  { %1121 = vtanh.f32 %v702_v43 }
 0xde0   :  { %v1122_v44 = vpop.eup %1121 }
 0xde1   :  { %705 = vrot.lane.b32.xlu1 %v1122_v44, %s1172_s7 }
 0xe53   :  { %v706_v45 = vpop.permute.xlu1 %705 }
 0xe54   :  { %v708_v46 = vmul.f32 %v706_v45, %v691_v32  ;;  %v1048_v32 = vld [vmem:[#allocation2 + $0x8] sm:$0xff]  }
 0xe56   :  { %v709_v47 = vpack.c.bf16 %v708_v46, %v708_v46 }
 0xe58   :  { %993 = vmatmul.mubr.msk.bf16.vlgmr.msra.gmra.mrb[24].mxu0 %vm229_vm2, %v709_v47 }
 0xe59   :  { %1011 = vmatpush3.bf16.msra.mxu0 %v1047_v10  ;;  %1018 = vmatprep.mubr.msk.bf16.mxu0 %vm1176_vm3, %v1175_v11 }
 0xe5a   :  { %1012 = vmatprep.subr.bf16.mxu0 %v1175_v11 }
 0xe5d   :  { %1013 = vmatpush3.bf16.msra.mxu0 %v1048_v32 }
 0xe5e   :  { %1014 = vmatprep.subr.bf16.mxu0 %v1175_v11 }
 0xe61   :  { %1015 = vmatpush3.bf16.msra.mxu0 %v1049_v35 }
 0xe62   :  { %1016 = vmatprep.subr.bf16.mxu0 %v1175_v11 }
 0xe65   :  { %1017 = vmatpush3.bf16.msra.mxu0 %v1050_v28 }
 0xf2b   :  { %v747_v50 = vpop.f32.mrb[24].mxu0 }
 0xf2c   :  { %v754_v51 = vadd.f32 %v747_v50, %v168_v48  ;;  %v749_v52 = vpop.f32.mrb[25].mxu0 }
 0xf2d   :  { %v755_v53 = vadd.f32 %v749_v52, %v170_v49  ;;  %v751_v54 = vpop.f32.mrb[26].mxu0 }
 0xf2e   :  { %v752_v55 = vpop.f32.mrb[27].mxu0  ;;  %v994_v36 = vmul.f32 -1.442695, %v754_v51 }
 0xf2f   :  { %v995_v56 = vmul.f32 -1.442695, %v755_v53 }
 0xf31   :  { %1123 = vpow2.f32 %v995_v56 }
 0xf32   :  { %1125 = vtanh.f32 %v755_v53 }
 0xf3b   :  { %v1124_v57 = vpop.eup %1123 }
 0xf3c   :  { %v763_v58 = vadd.f32 1.0, %v1124_v57  ;;  %v1126_v59 = vpop.eup %1125 }
 0xf3e   :  { %1127 = vrcp.f32 %v763_v58 }
 0xf3f   :  { %1129 = vpow2.f32 %v994_v36 }
 0xf48   :  { %v1128_v60 = vpop.eup %1127 }
 0xf49   :  { %v771_v34 = vsel %vm188_vm1, %v1128_v60, %v1126_v59  ;;  %v1130_v61 = vpop.eup %1129 }
 0xf4a   :  { %774 = vrot.lane.b32.xlu0 %v771_v34, %s1172_s7  ;;  %v762_v62 = vadd.f32 1.0, %v1130_v61 }
 0xf4c   :  { %1131 = vrcp.f32 %v762_v62 }
 0xf56   :  { %v1132_v63 = vpop.eup %1131 }
 0xf57   :  { %v772_v5 = vmul.f32 %v1132_v63, %v702_v43  ;;  %v999_v43 = vld [vmem:[%s1480_s5] ss:$0 sm:$0xff] }
 0xfbc   :  { %v775_v30 = vpop.permute.xlu0 %774 }
 0xfbd   :  { %v777_v31 = vmul.f32 %v1132_v63, %v775_v30 }
 0xfbf   :  { %779 = vrot.lane.b32.xlu1 %v777_v31, %s1172_s7 }
0x1031   :  { %v780_v6 = vpop.permute.xlu1 %779 }
0x1032   :  { %v782_v8 = vadd.f32 %v780_v6, %v772_v5 }
0x1034   :  { %1133 = vtanh.f32 %v782_v8 }
0x103e   :  { %v1134_v12 = vpop.eup %1133 }
0x103f   :  { %785 = vrot.lane.b32.xlu0 %v1134_v12, %s1172_s7 }
0x10b1   :  { %v786_v13 = vpop.permute.xlu0 %785 }
0x10b2   :  { %v788_v14 = vmul.f32 %v786_v13, %v771_v34 }
0x10b4   :  { %v789_v15 = vpack.c.bf16 %v788_v14, %v788_v14 }
0x10b6   :  { %996 = vmatmul.mubr.msk.bf16.vlgmr.msra.gmra.mrb[16].mxu1 %vm229_vm2, %v789_v15 }
0x1189   :  { %v827_v18 = vpop.f32.mrb[16].mxu1 }
0x118a   :  { %v834_v20 = vadd.f32 %v827_v18, %v172_v16  ;;  %v829_v22 = vpop.f32.mrb[17].mxu1 }
0x118b   :  { %v835_v23 = vadd.f32 %v829_v22, %v174_v17  ;;  %v831_v2 = vpop.f32.mrb[18].mxu1 }
0x118c   :  { %v832_v24 = vpop.f32.mrb[19].mxu1  ;;  %v997_v21 = vmul.f32 -1.442695, %v834_v20 }
0x118d   :  { %v998_v0 = vmul.f32 -1.442695, %v835_v23 }
0x118f   :  { %1135 = vpow2.f32 %v998_v0 }
0x1190   :  { %1137 = vtanh.f32 %v835_v23 }
0x1199   :  { %v1136_v25 = vpop.eup %1135 }
0x119a   :  { %v843_v3 = vadd.f32 1.0, %v1136_v25  ;;  %v1138_v26 = vpop.eup %1137 }
0x119c   :  { %1139 = vrcp.f32 %v843_v3 }
0x119d   :  { %1141 = vpow2.f32 %v997_v21 }
0x11a6   :  { %v1140_v4 = vpop.eup %1139 }
0x11a7   :  { %v851_v19 = vsel %vm188_vm1, %v1140_v4, %v1138_v26  ;;  %v1142_v37 = vpop.eup %1141 }
0x11a8   :  { %854 = vrot.lane.b32.xlu1 %v851_v19, %s1172_s7  ;;  %v842_v38 = vadd.f32 1.0, %v1142_v37 }
0x11aa   :  { %1143 = vrcp.f32 %v842_v38 }
0x11b4   :  { %v1144_v27 = vpop.eup %1143 }
0x11b5   :  { %v852_v33 = vmul.f32 %v1144_v27, %v782_v8 }
0x121a   :  { %v855_v7 = vpop.permute.xlu1 %854 }
0x121b   :  { %v857_v9 = vmul.f32 %v1144_v27, %v855_v7 }
0x121d   :  { %859 = vrot.lane.b32.xlu0 %v857_v9, %s1172_s7 }
0x128f   :  { %v860_v1 = vpop.permute.xlu0 %859 }
0x1290   :  { %v862_v29 = vadd.f32 %v860_v1, %v852_v33 }
0x1292   :  { %1145 = vtanh.f32 %v862_v29 }
0x129c   :  { %v1146_v39 = vpop.eup %1145 }
0x129d   :  { %865 = vrot.lane.b32.xlu1 %v1146_v39, %s1172_s7 }
0x130f   :  { %v866_v40 = vpop.permute.xlu1 %865 }
0x1310   :  { %v868_v41 = vmul.f32 %v866_v40, %v851_v19 }
0x1312   :  { %v869_v42 = vpack.c.bf16 %v868_v41, %v868_v41 }
0x1314   :  { %1019 = vmatmul.mubr.msk.bf16.vlgmr.msra.gmra.mrb[28].mxu0 %vm229_vm2, %v869_v42 }
0x13e7   :  { %v946_v44 = vpop.f32.mrb[28].mxu0 }
0x13e8   :  { %v947_v45 = vadd.f32 %v999_v43, %v946_v44  ;;  %v1020_v46 = vpop.f32.mrb[29].mxu0 }
0x13e9   :  { %v949_v47 = vpop.f32.mrb[30].mxu0 }
0x13ea   :  { %952 = vst [vmem:[%s1481_s6] sm:$0xff] %v947_v45  ;;  %v1021_v48 = vpop.f32.mrb[31].mxu0 }
0x13eb   :  { %957 = vsyncpa [#allocation3], 1 }

</bundles_post_ra>
